<compile_context>
chip_gen: v7x
topology: tpu7x:2x2x1
jax: 0.10.0
libtpu: 0.0.40
codegen_flags: <defaults>
</compile_context>

<pallas_src>
import functools

import jax
import jax.numpy as jnp
from jax.experimental import pallas as pl
from jax.experimental.pallas import tpu as pltpu


def mha_fusion_kernel(alpha_ref, gan_ref, vae_ref,
                      wq_ref, bq_ref, wk_ref, bk_ref, wv_ref, bv_ref,
                      wo_ref, bo_ref, out_ref, ctx_ref,
                      *, num_heads, head_dim, mxu_dtype):
    Bb, S, F = gan_ref.shape
    R = Bb * S
    D = head_dim
    scale = 1.0 / (D ** 0.5)

    gan = gan_ref[...].astype(jnp.float32)            # (Bb, S, F)
    vae = vae_ref[...].astype(jnp.float32)            # (Bb, S, F)

    # Flatten (batch, seq) rows -> single row-dense projection matmuls.
    gan2 = gan.reshape(R, F)
    vae2 = vae.reshape(R, F)
    gan2_m = gan2.astype(mxu_dtype)
    vae2_m = vae2.astype(mxu_dtype)

    # QKV projections (weights pre-transposed to (in, out) and in mxu_dtype).
    # The 1/sqrt(D) score scale is folded into Q once (f32 VPU multiply).
    q2 = (jnp.dot(gan2_m, wq_ref[...], preferred_element_type=jnp.float32)
          + bq_ref[...]) * scale
    k2 = jnp.dot(vae2_m, wk_ref[...], preferred_element_type=jnp.float32) + bk_ref[...]
    v2 = jnp.dot(vae2_m, wv_ref[...], preferred_element_type=jnp.float32) + bv_ref[...]

    q3 = q2.reshape(Bb, S, F)
    k3 = k2.reshape(Bb, S, F)
    v3 = v2.reshape(Bb, S, F)

    # Per-head attention (unrolled, H is small/static), batched over the Bb
    # batch rows via a single-batch-dim einsum (contracts the head dim
    # directly -> no explicit K transpose). Per-head contexts are written into
    # a VMEM scratch so the output projection can be ONE full-width matmul.
    for h in range(num_heads):
        lo = h * D
        hi = lo + D
        qh = q3[:, :, lo:hi].astype(mxu_dtype)         # (Bb, S, D)
        kh = k3[:, :, lo:hi].astype(mxu_dtype)         # (Bb, S, D)
        vh = v3[:, :, lo:hi].astype(mxu_dtype)         # (Bb, S, D)

        s = jnp.einsum('bqd,bkd->bqk', qh, kh,
                       preferred_element_type=jnp.float32)       # (Bb, S, S)
        s = s - jnp.max(s, axis=-1, keepdims=True)
        p = jnp.exp(s)
        p = p * pl.reciprocal(jnp.sum(p, axis=-1, keepdims=True), approx=True)
        # TODO(synk): attention-weight dropout omitted (eval-mode semantics);
        # training parity would need pltpu.prng_seed/prng_random_bits masking.

        ctx_h = jnp.einsum('bqk,bkd->bqd', p.astype(mxu_dtype), vh,
                           preferred_element_type=jnp.float32)   # (Bb, S, D)
        ctx_ref[:, :, lo:hi] = ctx_h

    # Single full-width output projection: (R, F) @ (F, F) on the MXU.
    ctx2 = ctx_ref[...].reshape(R, F)
    out2 = (jnp.dot(ctx2.astype(mxu_dtype), wo_ref[...],
                    preferred_element_type=jnp.float32) + bo_ref[...])

    alpha = alpha_ref[0, 0]
    fused = alpha * gan2 + (1.0 - alpha) * out2
    out_ref[...] = fused.reshape(Bb, S, F).astype(out_ref.dtype)


def _pick_batch_block(B, S, F, *, vmem_budget_bytes=8 * 1024 * 1024, min_grid=2):
    """VMEM-derived batch block.

    Approximate f32 VMEM bytes per batch row in a block: 2 inputs + 1 output,
    double-buffered (x2), plus q/k/v, ctx scratch, and the fused temp
    (~6 more row-sized live arrays).
    """
    per_row_bytes = (2 * 2 + 2 + 6) * S * F * 4
    cap = max(1, vmem_budget_bytes // per_row_bytes)
    bb = min(B, cap)
    # Keep at least `min_grid` grid steps so the parallel axis can shard
    # across both TensorCores on v7x (and amortize nothing is lost elsewhere).
    if B >= min_grid:
        bb = min(bb, B // min_grid)
    bb = max(bb, 1)
    while bb > 1 and B % bb != 0:
        bb -= 1
    return bb


def prepare_params(params, *, mxu_dtype=jnp.bfloat16):
    """One-time host-side weight prep (hoisted out of the per-call wrapper).

    Weights are transposed to (in, out) and cast to the MXU operand dtype;
    biases/alpha stay f32 (all elementwise work in the kernel is f32).
    """
    F = params["wq"].shape[0]
    prep = {
        "alpha": jnp.asarray(params["alpha"], jnp.float32).reshape(1, 1),
        "bq": jnp.asarray(params["bq"], jnp.float32).reshape(1, F),
        "bk": jnp.asarray(params["bk"], jnp.float32).reshape(1, F),
        "bv": jnp.asarray(params["bv"], jnp.float32).reshape(1, F),
        "bo": jnp.asarray(params["bo"], jnp.float32).reshape(1, F),
    }
    for name in ("wq", "wk", "wv", "wo"):
        prep[name] = jnp.asarray(params[name]).T.astype(mxu_dtype)
    return prep


def mha_fusion(gan_seq, vae_seq, prep, *, num_heads, batch_block=None):
    B, S, F = gan_seq.shape
    head_dim = F // num_heads
    Bb = batch_block if batch_block is not None else _pick_batch_block(B, S, F)
    assert B % Bb == 0
    mxu_dtype = prep["wq"].dtype

    seq_spec = pl.BlockSpec((Bb, S, F), lambda b: (b, 0, 0))
    w_spec = pl.BlockSpec((F, F), lambda b: (0, 0))    # grid-invariant: no re-DMA
    b_spec = pl.BlockSpec((1, F), lambda b: (0, 0))

    kernel = functools.partial(
        mha_fusion_kernel, num_heads=num_heads, head_dim=head_dim,
        mxu_dtype=mxu_dtype)

    return pl.pallas_call(
        kernel,
        out_shape=jax.ShapeDtypeStruct((B, S, F), gan_seq.dtype),
        grid_spec=pltpu.PrefetchScalarGridSpec(
            num_scalar_prefetch=0,
            grid=(B // Bb,),
            in_specs=[
                pl.BlockSpec(memory_space=pltpu.MemorySpace.SMEM),  # alpha
                seq_spec,          # gan_seq
                seq_spec,          # vae_seq
                w_spec, b_spec,    # query
                w_spec, b_spec,    # key
                w_spec, b_spec,    # value
                w_spec, b_spec,    # output
            ],
            out_specs=seq_spec,
            scratch_shapes=[pltpu.VMEM((Bb, S, F), jnp.float32)],   # ctx assembly
        ),
        compiler_params=pltpu.CompilerParams(
            dimension_semantics=("parallel",),
            vmem_limit_bytes=32 * 1024 * 1024),
    )(prep["alpha"], gan_seq, vae_seq,
      prep["wq"], prep["bq"], prep["wk"], prep["bk"],
      prep["wv"], prep["bv"], prep["wo"], prep["bo"])


def reference_jax(gan_seq, vae_seq, params, *, num_heads):
    """Pure-JAX f32 reference mirroring the PyTorch forward (eval mode)."""
    B, S, F = gan_seq.shape
    D = F // num_heads

    def linear(x, w, b):
        return jnp.einsum("bsf,of->bso", x, w) + b

    q = linear(gan_seq, params["wq"], params["bq"]).reshape(B, S, num_heads, D).transpose(0, 2, 1, 3)
    k = linear(vae_seq, params["wk"], params["bk"]).reshape(B, S, num_heads, D).transpose(0, 2, 1, 3)
    v = linear(vae_seq, params["wv"], params["bv"]).reshape(B, S, num_heads, D).transpose(0, 2, 1, 3)
    scores = jnp.einsum("bhqd,bhkd->bhqk", q, k) / (D ** 0.5)
    attn = jax.nn.softmax(scores, axis=-1)
    ctx = jnp.einsum("bhqk,bhkd->bhqd", attn, v).transpose(0, 2, 1, 3).reshape(B, S, F)
    out = linear(ctx, params["wo"], params["bo"])
    alpha = params["alpha"]
    return alpha * gan_seq + (1 - alpha) * out


if __name__ == "__main__":
    B, S, F = 2, 8, 32
    NUM_HEADS = 4

    key = jax.random.PRNGKey(0)
    keys = jax.random.split(key, 12)

    bound = 1.0 / (F ** 0.5)  # PyTorch Linear default init bound
    params = {
        "wq": jax.random.uniform(keys[0], (F, F), jnp.float32, -bound, bound),
        "bq": jax.random.uniform(keys[1], (F,), jnp.float32, -bound, bound),
        "wk": jax.random.uniform(keys[2], (F, F), jnp.float32, -bound, bound),
        "bk": jax.random.uniform(keys[3], (F,), jnp.float32, -bound, bound),
        "wv": jax.random.uniform(keys[4], (F, F), jnp.float32, -bound, bound),
        "bv": jax.random.uniform(keys[5], (F,), jnp.float32, -bound, bound),
        "wo": jax.random.uniform(keys[6], (F, F), jnp.float32, -bound, bound),
        "bo": jax.random.uniform(keys[7], (F,), jnp.float32, -bound, bound),
        "alpha": jnp.array(0.5, jnp.float32),
    }

    gan_seq = jax.random.normal(keys[8], (B, S, F), jnp.float32)
    vae_seq = jax.random.normal(keys[9], (B, S, F), jnp.float32)

    # One-time weight preparation (transpose + bf16 MXU-operand cast).
    prep = prepare_params(params, mxu_dtype=jnp.bfloat16)

    out = mha_fusion(gan_seq, vae_seq, prep, num_heads=NUM_HEADS)
    out = jax.block_until_ready(out)

    ref = reference_jax(gan_seq, vae_seq, params, num_heads=NUM_HEADS)
    assert out.shape == (B, S, F)
    # Tolerance accounts for bf16 MXU operands (f32 accumulation) and the EUP
    # approximate reciprocal in the softmax denominator (~1e-3 rel each).
    assert jnp.allclose(out, ref, atol=2e-2, rtol=2e-2)

    print("KERNEL_OK")
</pallas_src>

<mosaic_0001>
module attributes {stable_mosaic.version = 11 : i64} {
  func.func @mha_fusion_kernel(%arg0: i32, %arg1: memref<1x1xf32, #tpu.memory_space<smem>>, %arg2: memref<1x8x32xf32, #tpu.memory_space<vmem>>, %arg3: memref<1x8x32xf32, #tpu.memory_space<vmem>>, %arg4: memref<32x32xbf16, #tpu.memory_space<vmem>>, %arg5: memref<1x32xf32, #tpu.memory_space<vmem>>, %arg6: memref<32x32xbf16, #tpu.memory_space<vmem>>, %arg7: memref<1x32xf32, #tpu.memory_space<vmem>>, %arg8: memref<32x32xbf16, #tpu.memory_space<vmem>>, %arg9: memref<1x32xf32, #tpu.memory_space<vmem>>, %arg10: memref<32x32xbf16, #tpu.memory_space<vmem>>, %arg11: memref<1x32xf32, #tpu.memory_space<vmem>>, %arg12: memref<1x8x32xf32, #tpu.memory_space<vmem>>, %arg13: memref<1x8x32xf32, #tpu.memory_space<vmem>>) attributes {dimension_semantics = [#tpu.dimension_semantics<parallel>], iteration_bounds = array<i64: 2>, scalar_prefetch = 0 : i64, scratch_operands = 1 : i64, tpu.core_type = #tpu.core_type<tc>, window_params = [{transform_indices = @transform_0, window_bounds = array<i64: 1, 1>}, {transform_indices = @transform_1, window_bounds = array<i64: 1, 8, 32>}, {transform_indices = @transform_2, window_bounds = array<i64: 1, 8, 32>}, {pipeline_mode = #tpu.pipeline_mode<synchronous>, transform_indices = @transform_3, window_bounds = array<i64: 32, 32>}, {pipeline_mode = #tpu.pipeline_mode<synchronous>, transform_indices = @transform_4, window_bounds = array<i64: 1, 32>}, {pipeline_mode = #tpu.pipeline_mode<synchronous>, transform_indices = @transform_5, window_bounds = array<i64: 32, 32>}, {pipeline_mode = #tpu.pipeline_mode<synchronous>, transform_indices = @transform_6, window_bounds = array<i64: 1, 32>}, {pipeline_mode = #tpu.pipeline_mode<synchronous>, transform_indices = @transform_7, window_bounds = array<i64: 32, 32>}, {pipeline_mode = #tpu.pipeline_mode<synchronous>, transform_indices = @transform_8, window_bounds = array<i64: 1, 32>}, {pipeline_mode = #tpu.pipeline_mode<synchronous>, transform_indices = @transform_9, window_bounds = array<i64: 32, 32>}, {pipeline_mode = #tpu.pipeline_mode<synchronous>, transform_indices = @transform_10, window_bounds = array<i64: 1, 32>}, {transform_indices = @transform_11, window_bounds = array<i64: 1, 8, 32>}]} {
    %c0 = arith.constant 0 : index
    %c0_0 = arith.constant 0 : index
    %c0_1 = arith.constant 0 : index
    %0 = vector.load %arg2[%c0, %c0_0, %c0_1] : memref<1x8x32xf32, #tpu.memory_space<vmem>>, vector<1x8x32xf32>
    %c0_2 = arith.constant 0 : index
    %c0_3 = arith.constant 0 : index
    %c0_4 = arith.constant 0 : index
    %1 = vector.load %arg3[%c0_2, %c0_3, %c0_4] : memref<1x8x32xf32, #tpu.memory_space<vmem>>, vector<1x8x32xf32>
    %2 = vector.shape_cast %0 : vector<1x8x32xf32> to vector<8x32xf32>
    %3 = vector.shape_cast %1 : vector<1x8x32xf32> to vector<8x32xf32>
    %4 = arith.truncf %2 : vector<8x32xf32> to vector<8x32xbf16>
    %5 = arith.truncf %3 : vector<8x32xf32> to vector<8x32xbf16>
    %c0_5 = arith.constant 0 : index
    %c0_6 = arith.constant 0 : index
    %6 = vector.load %arg4[%c0_5, %c0_6] : memref<32x32xbf16, #tpu.memory_space<vmem>>, vector<32x32xbf16>
    %cst = arith.constant dense<0.000000e+00> : vector<8x32xf32>
    %7 = tpu.matmul %4, %6, %cst {dimension_numbers = #tpu.dot_dimension_numbers<[1], [0], [0], [1], [0, 0, 1, 1], [], []>} : vector<8x32xbf16>, vector<32x32xbf16>, vector<8x32xf32> -> vector<8x32xf32>
    %c0_7 = arith.constant 0 : index
    %c0_8 = arith.constant 0 : index
    %8 = vector.load %arg5[%c0_7, %c0_8] : memref<1x32xf32, #tpu.memory_space<vmem>>, vector<1x32xf32>
    %9 = vector.broadcast %8 : vector<1x32xf32> to vector<8x32xf32>
    %10 = arith.addf %7, %9 : vector<8x32xf32>
    %cst_9 = arith.constant 0.353553385 : f32
    %11 = vector.broadcast %cst_9 : f32 to vector<8x32xf32>
    %12 = arith.mulf %10, %11 : vector<8x32xf32>
    %c0_10 = arith.constant 0 : index
    %c0_11 = arith.constant 0 : index
    %13 = vector.load %arg6[%c0_10, %c0_11] : memref<32x32xbf16, #tpu.memory_space<vmem>>, vector<32x32xbf16>
    %cst_12 = arith.constant dense<0.000000e+00> : vector<8x32xf32>
    %14 = tpu.matmul %5, %13, %cst_12 {dimension_numbers = #tpu.dot_dimension_numbers<[1], [0], [0], [1], [0, 0, 1, 1], [], []>} : vector<8x32xbf16>, vector<32x32xbf16>, vector<8x32xf32> -> vector<8x32xf32>
    %c0_13 = arith.constant 0 : index
    %c0_14 = arith.constant 0 : index
    %15 = vector.load %arg7[%c0_13, %c0_14] : memref<1x32xf32, #tpu.memory_space<vmem>>, vector<1x32xf32>
    %16 = vector.broadcast %15 : vector<1x32xf32> to vector<8x32xf32>
    %17 = arith.addf %14, %16 : vector<8x32xf32>
    %c0_15 = arith.constant 0 : index
    %c0_16 = arith.constant 0 : index
    %18 = vector.load %arg8[%c0_15, %c0_16] : memref<32x32xbf16, #tpu.memory_space<vmem>>, vector<32x32xbf16>
    %cst_17 = arith.constant dense<0.000000e+00> : vector<8x32xf32>
    %19 = tpu.matmul %5, %18, %cst_17 {dimension_numbers = #tpu.dot_dimension_numbers<[1], [0], [0], [1], [0, 0, 1, 1], [], []>} : vector<8x32xbf16>, vector<32x32xbf16>, vector<8x32xf32> -> vector<8x32xf32>
    %c0_18 = arith.constant 0 : index
    %c0_19 = arith.constant 0 : index
    %20 = vector.load %arg9[%c0_18, %c0_19] : memref<1x32xf32, #tpu.memory_space<vmem>>, vector<1x32xf32>
    %21 = vector.broadcast %20 : vector<1x32xf32> to vector<8x32xf32>
    %22 = arith.addf %19, %21 : vector<8x32xf32>
    %23 = vector.shape_cast %12 : vector<8x32xf32> to vector<1x8x32xf32>
    %24 = vector.shape_cast %17 : vector<8x32xf32> to vector<1x8x32xf32>
    %25 = vector.shape_cast %22 : vector<8x32xf32> to vector<1x8x32xf32>
    %26 = vector.extract_strided_slice %23 {offsets = [0, 0, 0], sizes = [1, 8, 8], strides = [1, 1, 1]} : vector<1x8x32xf32> to vector<1x8x8xf32>
    %27 = arith.truncf %26 : vector<1x8x8xf32> to vector<1x8x8xbf16>
    %28 = vector.extract_strided_slice %24 {offsets = [0, 0, 0], sizes = [1, 8, 8], strides = [1, 1, 1]} : vector<1x8x32xf32> to vector<1x8x8xf32>
    %29 = arith.truncf %28 : vector<1x8x8xf32> to vector<1x8x8xbf16>
    %30 = vector.extract_strided_slice %25 {offsets = [0, 0, 0], sizes = [1, 8, 8], strides = [1, 1, 1]} : vector<1x8x32xf32> to vector<1x8x8xf32>
    %31 = arith.truncf %30 : vector<1x8x8xf32> to vector<1x8x8xbf16>
    "tpu.trace_start"() <{level = 10 : i32, message = "bqd,bkd->bqk"}> : () -> ()
    %cst_20 = arith.constant dense<0.000000e+00> : vector<1x8x8xf32>
    %32 = tpu.matmul %27, %29, %cst_20 {dimension_numbers = #tpu.dot_dimension_numbers<[2], [2], [1], [1], [0, 0, 0, 1, 1, 1], [0], [0]>} : vector<1x8x8xbf16>, vector<1x8x8xbf16>, vector<1x8x8xf32> -> vector<1x8x8xf32>
    "tpu.trace_stop"() : () -> ()
    %cst_21 = arith.constant dense<0xFF800000> : vector<1x8xf32>
    %33 = vector.multi_reduction <maximumf>, %32, %cst_21 [2] : vector<1x8x8xf32> to vector<1x8xf32>
    %34 = vector.shape_cast %33 : vector<1x8xf32> to vector<1x8x1xf32>
    %35 = vector.broadcast %34 : vector<1x8x1xf32> to vector<1x8x8xf32>
    %36 = arith.subf %32, %35 : vector<1x8x8xf32>
    %37 = math.exp %36 : vector<1x8x8xf32>
    %cst_22 = arith.constant dense<0.000000e+00> : vector<1x8xf32>
    %38 = vector.multi_reduction <add>, %37, %cst_22 [2] : vector<1x8x8xf32> to vector<1x8xf32>
    %39 = vector.shape_cast %38 : vector<1x8xf32> to vector<1x8x1xf32>
    %40 = tpu.reciprocal %39 {approx = true} : vector<1x8x1xf32> -> vector<1x8x1xf32>
    %41 = vector.broadcast %40 : vector<1x8x1xf32> to vector<1x8x8xf32>
    %42 = arith.mulf %37, %41 : vector<1x8x8xf32>
    %43 = arith.truncf %42 : vector<1x8x8xf32> to vector<1x8x8xbf16>
    "tpu.trace_start"() <{level = 10 : i32, message = "bqk,bkd->bqd"}> : () -> ()
    %cst_23 = arith.constant dense<0.000000e+00> : vector<1x8x8xf32>
    %44 = tpu.matmul %43, %31, %cst_23 {dimension_numbers = #tpu.dot_dimension_numbers<[2], [1], [1], [2], [0, 0, 0, 1, 1, 2], [0], [0]>} : vector<1x8x8xbf16>, vector<1x8x8xbf16>, vector<1x8x8xf32> -> vector<1x8x8xf32>
    "tpu.trace_stop"() : () -> ()
    %c0_24 = arith.constant 0 : index
    %c0_25 = arith.constant 0 : index
    %c0_26 = arith.constant 0 : index
    %45 = vector.load %arg13[%c0_24, %c0_25, %c0_26] : memref<1x8x32xf32, #tpu.memory_space<vmem>>, vector<1x8x8xf32>
    tpu.vector_store %arg13[%c0_24, %c0_25, %c0_26], %44 {strides = array<i32>} : memref<1x8x32xf32, #tpu.memory_space<vmem>>, vector<1x8x8xf32>,
    %46 = vector.extract_strided_slice %23 {offsets = [0, 0, 8], sizes = [1, 8, 8], strides = [1, 1, 1]} : vector<1x8x32xf32> to vector<1x8x8xf32>
    %47 = arith.truncf %46 : vector<1x8x8xf32> to vector<1x8x8xbf16>
    %48 = vector.extract_strided_slice %24 {offsets = [0, 0, 8], sizes = [1, 8, 8], strides = [1, 1, 1]} : vector<1x8x32xf32> to vector<1x8x8xf32>
    %49 = arith.truncf %48 : vector<1x8x8xf32> to vector<1x8x8xbf16>
    %50 = vector.extract_strided_slice %25 {offsets = [0, 0, 8], sizes = [1, 8, 8], strides = [1, 1, 1]} : vector<1x8x32xf32> to vector<1x8x8xf32>
    %51 = arith.truncf %50 : vector<1x8x8xf32> to vector<1x8x8xbf16>
    "tpu.trace_start"() <{level = 10 : i32, message = "bqd,bkd->bqk"}> : () -> ()
    %cst_27 = arith.constant dense<0.000000e+00> : vector<1x8x8xf32>
    %52 = tpu.matmul %47, %49, %cst_27 {dimension_numbers = #tpu.dot_dimension_numbers<[2], [2], [1], [1], [0, 0, 0, 1, 1, 1], [0], [0]>} : vector<1x8x8xbf16>, vector<1x8x8xbf16>, vector<1x8x8xf32> -> vector<1x8x8xf32>
    "tpu.trace_stop"() : () -> ()
    %cst_28 = arith.constant dense<0xFF800000> : vector<1x8xf32>
    %53 = vector.multi_reduction <maximumf>, %52, %cst_28 [2] : vector<1x8x8xf32> to vector<1x8xf32>
    %54 = vector.shape_cast %53 : vector<1x8xf32> to vector<1x8x1xf32>
    %55 = vector.broadcast %54 : vector<1x8x1xf32> to vector<1x8x8xf32>
    %56 = arith.subf %52, %55 : vector<1x8x8xf32>
    %57 = math.exp %56 : vector<1x8x8xf32>
    %cst_29 = arith.constant dense<0.000000e+00> : vector<1x8xf32>
    %58 = vector.multi_reduction <add>, %57, %cst_29 [2] : vector<1x8x8xf32> to vector<1x8xf32>
    %59 = vector.shape_cast %58 : vector<1x8xf32> to vector<1x8x1xf32>
    %60 = tpu.reciprocal %59 {approx = true} : vector<1x8x1xf32> -> vector<1x8x1xf32>
    %61 = vector.broadcast %60 : vector<1x8x1xf32> to vector<1x8x8xf32>
    %62 = arith.mulf %57, %61 : vector<1x8x8xf32>
    %63 = arith.truncf %62 : vector<1x8x8xf32> to vector<1x8x8xbf16>
    "tpu.trace_start"() <{level = 10 : i32, message = "bqk,bkd->bqd"}> : () -> ()
    %cst_30 = arith.constant dense<0.000000e+00> : vector<1x8x8xf32>
    %64 = tpu.matmul %63, %51, %cst_30 {dimension_numbers = #tpu.dot_dimension_numbers<[2], [1], [1], [2], [0, 0, 0, 1, 1, 2], [0], [0]>} : vector<1x8x8xbf16>, vector<1x8x8xbf16>, vector<1x8x8xf32> -> vector<1x8x8xf32>
    "tpu.trace_stop"() : () -> ()
    %c0_31 = arith.constant 0 : index
    %c0_32 = arith.constant 0 : index
    %c8 = arith.constant 8 : index
    %65 = vector.load %arg13[%c0_31, %c0_32, %c8] : memref<1x8x32xf32, #tpu.memory_space<vmem>>, vector<1x8x8xf32>
    tpu.vector_store %arg13[%c0_31, %c0_32, %c8], %64 {strides = array<i32>} : memref<1x8x32xf32, #tpu.memory_space<vmem>>, vector<1x8x8xf32>,
    %66 = vector.extract_strided_slice %23 {offsets = [0, 0, 16], sizes = [1, 8, 8], strides = [1, 1, 1]} : vector<1x8x32xf32> to vector<1x8x8xf32>
    %67 = arith.truncf %66 : vector<1x8x8xf32> to vector<1x8x8xbf16>
    %68 = vector.extract_strided_slice %24 {offsets = [0, 0, 16], sizes = [1, 8, 8], strides = [1, 1, 1]} : vector<1x8x32xf32> to vector<1x8x8xf32>
    %69 = arith.truncf %68 : vector<1x8x8xf32> to vector<1x8x8xbf16>
    %70 = vector.extract_strided_slice %25 {offsets = [0, 0, 16], sizes = [1, 8, 8], strides = [1, 1, 1]} : vector<1x8x32xf32> to vector<1x8x8xf32>
    %71 = arith.truncf %70 : vector<1x8x8xf32> to vector<1x8x8xbf16>
    "tpu.trace_start"() <{level = 10 : i32, message = "bqd,bkd->bqk"}> : () -> ()
    %cst_33 = arith.constant dense<0.000000e+00> : vector<1x8x8xf32>
    %72 = tpu.matmul %67, %69, %cst_33 {dimension_numbers = #tpu.dot_dimension_numbers<[2], [2], [1], [1], [0, 0, 0, 1, 1, 1], [0], [0]>} : vector<1x8x8xbf16>, vector<1x8x8xbf16>, vector<1x8x8xf32> -> vector<1x8x8xf32>
    "tpu.trace_stop"() : () -> ()
    %cst_34 = arith.constant dense<0xFF800000> : vector<1x8xf32>
    %73 = vector.multi_reduction <maximumf>, %72, %cst_34 [2] : vector<1x8x8xf32> to vector<1x8xf32>
    %74 = vector.shape_cast %73 : vector<1x8xf32> to vector<1x8x1xf32>
    %75 = vector.broadcast %74 : vector<1x8x1xf32> to vector<1x8x8xf32>
    %76 = arith.subf %72, %75 : vector<1x8x8xf32>
    %77 = math.exp %76 : vector<1x8x8xf32>
    %cst_35 = arith.constant dense<0.000000e+00> : vector<1x8xf32>
    %78 = vector.multi_reduction <add>, %77, %cst_35 [2] : vector<1x8x8xf32> to vector<1x8xf32>
    %79 = vector.shape_cast %78 : vector<1x8xf32> to vector<1x8x1xf32>
    %80 = tpu.reciprocal %79 {approx = true} : vector<1x8x1xf32> -> vector<1x8x1xf32>
    %81 = vector.broadcast %80 : vector<1x8x1xf32> to vector<1x8x8xf32>
    %82 = arith.mulf %77, %81 : vector<1x8x8xf32>
    %83 = arith.truncf %82 : vector<1x8x8xf32> to vector<1x8x8xbf16>
    "tpu.trace_start"() <{level = 10 : i32, message = "bqk,bkd->bqd"}> : () -> ()
    %cst_36 = arith.constant dense<0.000000e+00> : vector<1x8x8xf32>
    %84 = tpu.matmul %83, %71, %cst_36 {dimension_numbers = #tpu.dot_dimension_numbers<[2], [1], [1], [2], [0, 0, 0, 1, 1, 2], [0], [0]>} : vector<1x8x8xbf16>, vector<1x8x8xbf16>, vector<1x8x8xf32> -> vector<1x8x8xf32>
    "tpu.trace_stop"() : () -> ()
    %c0_37 = arith.constant 0 : index
    %c0_38 = arith.constant 0 : index
    %c16 = arith.constant 16 : index
    %85 = vector.load %arg13[%c0_37, %c0_38, %c16] : memref<1x8x32xf32, #tpu.memory_space<vmem>>, vector<1x8x8xf32>
    tpu.vector_store %arg13[%c0_37, %c0_38, %c16], %84 {strides = array<i32>} : memref<1x8x32xf32, #tpu.memory_space<vmem>>, vector<1x8x8xf32>,
    %86 = vector.extract_strided_slice %23 {offsets = [0, 0, 24], sizes = [1, 8, 8], strides = [1, 1, 1]} : vector<1x8x32xf32> to vector<1x8x8xf32>
    %87 = arith.truncf %86 : vector<1x8x8xf32> to vector<1x8x8xbf16>
    %88 = vector.extract_strided_slice %24 {offsets = [0, 0, 24], sizes = [1, 8, 8], strides = [1, 1, 1]} : vector<1x8x32xf32> to vector<1x8x8xf32>
    %89 = arith.truncf %88 : vector<1x8x8xf32> to vector<1x8x8xbf16>
    %90 = vector.extract_strided_slice %25 {offsets = [0, 0, 24], sizes = [1, 8, 8], strides = [1, 1, 1]} : vector<1x8x32xf32> to vector<1x8x8xf32>
    %91 = arith.truncf %90 : vector<1x8x8xf32> to vector<1x8x8xbf16>
    "tpu.trace_start"() <{level = 10 : i32, message = "bqd,bkd->bqk"}> : () -> ()
    %cst_39 = arith.constant dense<0.000000e+00> : vector<1x8x8xf32>
    %92 = tpu.matmul %87, %89, %cst_39 {dimension_numbers = #tpu.dot_dimension_numbers<[2], [2], [1], [1], [0, 0, 0, 1, 1, 1], [0], [0]>} : vector<1x8x8xbf16>, vector<1x8x8xbf16>, vector<1x8x8xf32> -> vector<1x8x8xf32>
    "tpu.trace_stop"() : () -> ()
    %cst_40 = arith.constant dense<0xFF800000> : vector<1x8xf32>
    %93 = vector.multi_reduction <maximumf>, %92, %cst_40 [2] : vector<1x8x8xf32> to vector<1x8xf32>
    %94 = vector.shape_cast %93 : vector<1x8xf32> to vector<1x8x1xf32>
    %95 = vector.broadcast %94 : vector<1x8x1xf32> to vector<1x8x8xf32>
    %96 = arith.subf %92, %95 : vector<1x8x8xf32>
    %97 = math.exp %96 : vector<1x8x8xf32>
    %cst_41 = arith.constant dense<0.000000e+00> : vector<1x8xf32>
    %98 = vector.multi_reduction <add>, %97, %cst_41 [2] : vector<1x8x8xf32> to vector<1x8xf32>
    %99 = vector.shape_cast %98 : vector<1x8xf32> to vector<1x8x1xf32>
    %100 = tpu.reciprocal %99 {approx = true} : vector<1x8x1xf32> -> vector<1x8x1xf32>
    %101 = vector.broadcast %100 : vector<1x8x1xf32> to vector<1x8x8xf32>
    %102 = arith.mulf %97, %101 : vector<1x8x8xf32>
    %103 = arith.truncf %102 : vector<1x8x8xf32> to vector<1x8x8xbf16>
    "tpu.trace_start"() <{level = 10 : i32, message = "bqk,bkd->bqd"}> : () -> ()
    %cst_42 = arith.constant dense<0.000000e+00> : vector<1x8x8xf32>
    %104 = tpu.matmul %103, %91, %cst_42 {dimension_numbers = #tpu.dot_dimension_numbers<[2], [1], [1], [2], [0, 0, 0, 1, 1, 2], [0], [0]>} : vector<1x8x8xbf16>, vector<1x8x8xbf16>, vector<1x8x8xf32> -> vector<1x8x8xf32>
    "tpu.trace_stop"() : () -> ()
    %c0_43 = arith.constant 0 : index
    %c0_44 = arith.constant 0 : index
    %c24 = arith.constant 24 : index
    %105 = vector.load %arg13[%c0_43, %c0_44, %c24] : memref<1x8x32xf32, #tpu.memory_space<vmem>>, vector<1x8x8xf32>
    tpu.vector_store %arg13[%c0_43, %c0_44, %c24], %104 {strides = array<i32>} : memref<1x8x32xf32, #tpu.memory_space<vmem>>, vector<1x8x8xf32>,
    %c0_45 = arith.constant 0 : index
    %c0_46 = arith.constant 0 : index
    %c0_47 = arith.constant 0 : index
    %106 = vector.load %arg13[%c0_45, %c0_46, %c0_47] : memref<1x8x32xf32, #tpu.memory_space<vmem>>, vector<1x8x32xf32>
    %107 = vector.shape_cast %106 : vector<1x8x32xf32> to vector<8x32xf32>
    %108 = arith.truncf %107 : vector<8x32xf32> to vector<8x32xbf16>
    %c0_48 = arith.constant 0 : index
    %c0_49 = arith.constant 0 : index
    %109 = vector.load %arg10[%c0_48, %c0_49] : memref<32x32xbf16, #tpu.memory_space<vmem>>, vector<32x32xbf16>
    %cst_50 = arith.constant dense<0.000000e+00> : vector<8x32xf32>
    %110 = tpu.matmul %108, %109, %cst_50 {dimension_numbers = #tpu.dot_dimension_numbers<[1], [0], [0], [1], [0, 0, 1, 1], [], []>} : vector<8x32xbf16>, vector<32x32xbf16>, vector<8x32xf32> -> vector<8x32xf32>
    %c0_51 = arith.constant 0 : index
    %c0_52 = arith.constant 0 : index
    %111 = vector.load %arg11[%c0_51, %c0_52] : memref<1x32xf32, #tpu.memory_space<vmem>>, vector<1x32xf32>
    %112 = vector.broadcast %111 : vector<1x32xf32> to vector<8x32xf32>
    %113 = arith.addf %110, %112 : vector<8x32xf32>
    %c0_53 = arith.constant 0 : index
    %c0_54 = arith.constant 0 : index
    %114 = memref.load %arg1[%c0_53, %c0_54] : memref<1x1xf32, #tpu.memory_space<smem>>
    %115 = vector.broadcast %114 : f32 to vector<8x32xf32>
    %116 = arith.mulf %115, %2 : vector<8x32xf32>
    %cst_55 = arith.constant 1.000000e+00 : f32
    %117 = arith.subf %cst_55, %114 : f32
    %118 = vector.broadcast %117 : f32 to vector<8x32xf32>
    %119 = arith.mulf %118, %113 : vector<8x32xf32>
    %120 = arith.addf %116, %119 : vector<8x32xf32>
    %121 = vector.shape_cast %120 : vector<8x32xf32> to vector<1x8x32xf32>
    %c0_56 = arith.constant 0 : index
    %c0_57 = arith.constant 0 : index
    %c0_58 = arith.constant 0 : index
    %122 = vector.load %arg12[%c0_56, %c0_57, %c0_58] : memref<1x8x32xf32, #tpu.memory_space<vmem>>, vector<1x8x32xf32>
    tpu.vector_store %arg12[%c0_56, %c0_57, %c0_58], %121 {strides = array<i32>} : memref<1x8x32xf32, #tpu.memory_space<vmem>>, vector<1x8x32xf32>,
    return
  }
  func.func @transform_0(%arg0: i32) -> (i32, i32) {
    %c0_i32 = arith.constant 0 : i32
    %c0_i32_0 = arith.constant 0 : i32
    %c0_i32_1 = arith.constant 0 : i32
    return %c0_i32, %c0_i32_0 : i32, i32
  }
  func.func @transform_1(%arg0: i32) -> (i32, i32, i32) {
    %c0_i32 = arith.constant 0 : i32
    %c0_i32_0 = arith.constant 0 : i32
    %c0_i32_1 = arith.constant 0 : i32
    return %arg0, %c0_i32, %c0_i32_0 : i32, i32, i32
  }
  func.func @transform_2(%arg0: i32) -> (i32, i32, i32) {
    %c0_i32 = arith.constant 0 : i32
    %c0_i32_0 = arith.constant 0 : i32
    %c0_i32_1 = arith.constant 0 : i32
    return %arg0, %c0_i32, %c0_i32_0 : i32, i32, i32
  }
  func.func @transform_3(%arg0: i32) -> (i32, i32) {
    %c0_i32 = arith.constant 0 : i32
    %c0_i32_0 = arith.constant 0 : i32
    %c0_i32_1 = arith.constant 0 : i32
    return %c0_i32, %c0_i32_0 : i32, i32
  }
  func.func @transform_4(%arg0: i32) -> (i32, i32) {
    %c0_i32 = arith.constant 0 : i32
    %c0_i32_0 = arith.constant 0 : i32
    %c0_i32_1 = arith.constant 0 : i32
    return %c0_i32, %c0_i32_0 : i32, i32
  }
  func.func @transform_5(%arg0: i32) -> (i32, i32) {
    %c0_i32 = arith.constant 0 : i32
    %c0_i32_0 = arith.constant 0 : i32
    %c0_i32_1 = arith.constant 0 : i32
    return %c0_i32, %c0_i32_0 : i32, i32
  }
  func.func @transform_6(%arg0: i32) -> (i32, i32) {
    %c0_i32 = arith.constant 0 : i32
    %c0_i32_0 = arith.constant 0 : i32
    %c0_i32_1 = arith.constant 0 : i32
    return %c0_i32, %c0_i32_0 : i32, i32
  }
  func.func @transform_7(%arg0: i32) -> (i32, i32) {
    %c0_i32 = arith.constant 0 : i32
    %c0_i32_0 = arith.constant 0 : i32
    %c0_i32_1 = arith.constant 0 : i32
    return %c0_i32, %c0_i32_0 : i32, i32
  }
  func.func @transform_8(%arg0: i32) -> (i32, i32) {
    %c0_i32 = arith.constant 0 : i32
    %c0_i32_0 = arith.constant 0 : i32
    %c0_i32_1 = arith.constant 0 : i32
    return %c0_i32, %c0_i32_0 : i32, i32
  }
  func.func @transform_9(%arg0: i32) -> (i32, i32) {
    %c0_i32 = arith.constant 0 : i32
    %c0_i32_0 = arith.constant 0 : i32
    %c0_i32_1 = arith.constant 0 : i32
    return %c0_i32, %c0_i32_0 : i32, i32
  }
  func.func @transform_10(%arg0: i32) -> (i32, i32) {
    %c0_i32 = arith.constant 0 : i32
    %c0_i32_0 = arith.constant 0 : i32
    %c0_i32_1 = arith.constant 0 : i32
    return %c0_i32, %c0_i32_0 : i32, i32
  }
  func.func @transform_11(%arg0: i32) -> (i32, i32, i32) {
    %c0_i32 = arith.constant 0 : i32
    %c0_i32_0 = arith.constant 0 : i32
    %c0_i32_1 = arith.constant 0 : i32
    return %arg0, %c0_i32, %c0_i32_0 : i32, i32, i32
  }
}

</mosaic_0001>

<bundles_post_ra>
// kernel: tpu_custom_call.1
= control target key start
LH: loop header
LB: loop body
LE: loop exit
PB: predicated region body
PF: predicated region fallthrough
CT: control target
= control target key end

     0   :  { %s2325_s0 = inlined_call_operand.<no memory space> [shape: f32[1,1], index: 0, kind: input, shape index: {}]   ;;  %s2326_s1 = inlined_call_operand.hbm [shape: f32[2,8,32], index: 1, kind: input, shape index: {}]   ;;  %s2327_s2 = inlined_call_operand.hbm [shape: f32[2,8,32], index: 2, kind: input, shape index: {}]   ;;  %s2328_s3 = inlined_call_operand.hbm [shape: bf16[32,32], index: 3, kind: input, shape index: {}]   ;;  %s2329_s4 = inlined_call_operand.vmem [shape: f32[1,32], index: 4, kind: input, shape index: {}]   ;;  %s2330_s5 = inlined_call_operand.vmem [shape: bf16[32,32], index: 5, kind: input, shape index: {}]   ;;  %s2331_s6 = inlined_call_operand.vmem [shape: f32[1,32], index: 6, kind: input, shape index: {}]   ;;  %s2332_s7 = inlined_call_operand.hbm [shape: bf16[32,32], index: 7, kind: input, shape index: {}]   ;;  %s2333_s8 = inlined_call_operand.hbm [shape: f32[1,32], index: 8, kind: input, shape index: {}]   ;;  %s2334_s9 = inlined_call_operand.vmem [shape: bf16[32,32], index: 9, kind: input, shape index: {}]   ;;  %s2335_s10 = inlined_call_operand.vmem [shape: f32[1,32], index: 10, kind: input, shape index: {}]   ;;  %s2336_s11 = inlined_call_operand.hbm [shape: f32[2,8,32], index: 11, kind: output, shape index: {}]  }
   0x1   :  { %2344 = sst [smem:[#allocation21_spill]] %s2328_s3 }
   0x2   :  { %2345 = sst [smem:[#allocation22_spill]] %s2332_s7 }
   0x3   :  { %2346 = sst [smem:[#allocation23_spill]] %s2333_s8 }
   0x4   :  { %2347 = sst [smem:[#allocation24_spill]] %s2335_s10 }
   0x5   :  { %2348 = sst [smem:[#allocation25_spill]] %s2336_s11 }
   0x6   :  { %16 = sst [smem:[#allocation3]] %s2325_s0 }
   0x7   :  { %17 = vsyncpa [#allocation5], 0 }
   0x8   :  { %19 = vsyncpa [#allocation5 + $0x1], 0 }
   0x9   :  { %20 = vsyncpa [#allocation8], 0 }
   0xa   :  { %22 = vsyncpa [#allocation8 + $0x1], 0 }
   0xb   :  { %23 = vsyncpa [#allocation11], 0 }
   0xc   :  { %24 = vsyncpa [#allocation6], 0 }
   0xd   :  { %26 = vsyncpa [#allocation6 + $0x1], 0  ;;  %s1927_s19 = smov 0   ;;  %s1929_s20 = smov 0  }
   0xe   :  { %s1931_s21 = smov 0   ;;  %s1933_s22 = smov 0  }
   0xf LB: > { %2349 = sst [smem:[#allocation19_spill]] %s1834_s19  ;;  %s1948_s0 = sadd.s32 4294967295, %s1846_s22   ;;  %s1846_s22 = sphi %s1933_s22, %s2378_s22   ;;  %s1842_s21 = sphi %s1931_s21, %s2377_s21   ;;  %s1838_s20 = sphi %s1929_s20, %s2376_s20   ;;  %s1834_s19 = sphi %s1927_s19, %s2375_s19  }
  0x10   : > { %s1355_s23 = sadd.s32 4294967294, %s1846_s22   ;;  %p73_p0 = scmp.ne.s32.totalorder %s1838_s20, %s1834_s19 }
  0x11   : > { %p2337_p1 = scmp.eq.s32.totalorder %s1948_s0, 0  ;;  %p297_p3 = scmp.eq.s32.totalorder %s1355_s23, 1 }
  0x12   : > { %p1356_p5 = scmp.ge.s32.totalorder %s1846_s22, 1  ;;  %p304_p7 = scmp.lt.s32.totalorder %s1846_s22, 3 }
  0x13   : > { %p1957_p4 = por %p2337_p1, %p73_p0  ;;  %p1962_p6 = por %p297_p3, %p73_p0 }
  0x14   : > { %p1967_p8 = pnand %p1356_p5, %p304_p7  ;;  %s1848_s27 = smov [#allocation9]  }
  0x15   : > { %s2350_s24 = scalar_select %p1957_p4, 1, 0 }
  0x16   : > { %s2351_s25 = scalar_select %p1962_p6, 1, 0 }
  0x17   : > { %s2353_s26 = scalar_select %p1967_p8, 1, 0 }
  0x18   : > { %2352 = sst [smem:[#allocation20_spill]] %s2351_s25  ;;  %s319_s28 = sshll.u32 %s1848_s27, 4  ;;  %s1971_s28 = int_to_ptr.vmem [resolvable:$true] %s319_s28 }
  0x19   : > { %p1526_p9 = pneg %p1967_p8  ;;  %s1849_s30 = smov [#allocation10]  }
  0x1a   : > { %s341_s12 = sshll.u32 %s1849_s30, 4  ;;  %s1850_s13 = smov [#allocation12]   ;;  %s1982_s12 = int_to_ptr.vmem [resolvable:$true] %s341_s12 }
  0x1b   : > { %p1978_p11 = pnand %p1526_p9, %p2337_p1  ;;  %s1984_s14 = sshll.u32 %s1850_s13, 4  ;;  %s356_s14 = int_to_ptr.vmem [resolvable:$true] %s1984_s14 }
  0x1c   : > { %s2355_s3 = sld [smem:[#allocation21_spill]] }
  0x1d   : > { %p1994_p13 = pneg %p1978_p11 }
  0x22   : > { %s1624_s17 = scalar_lea.hbm %s2355_s3, 256 }
  0x23   : > { %p1625_p12 = scmp.ne.s32.totalorder %s2355_s3, %s1624_s17  ;;  %p1631_p5 = scmp.lt.u32.totalorder %s1624_s17, %s2355_s3 }
  0x25   : > { %p1627_p0 = pnand %p1994_p13, %p1625_p12 }
  0x27   : > { %p1628_p3 = pneg %p1627_p0 }
  0x29   : > { %p1633_p7 = pnand %p1631_p5, %p1628_p3 }
  0x2b   : > { %1636 = shalt.err (!%p1633_p7)
}
  0x2c   : > { %s1637_s15 = scalar_lea.vmem %s1971_s28, 256  ;;  %p1645_p2 = scmp.lt.s32.totalorder %s1971_s28, %s1971_s28 }
  0x2d   : > { %p1638_p9 = scmp.ne.s32.totalorder %s1971_s28, %s1637_s15  ;;  %p1646_p6 = scmp.lt.s32.totalorder %s1637_s15, %s1637_s15 }
  0x2f   : > { %p1640_p10 = pnand %p1638_p9, %p1994_p13  ;;  %p1647_p12 = por %p1646_p6, %p1645_p2 }
  0x31   : > { %p1641_p1 = pneg %p1640_p10 }
  0x33   : > { %p1648_p0 = pnand %p1647_p12, %p1641_p1 }
  0x35   : > { %1651 = shalt.err (!%p1648_p0)
}
  0x36   : > { %s1851_s16 = smov 64   ;;  %s1852_s17 = smov 4  }
  0x37   : > { %1529 = dma.hbm_to_vmem [thread:$0]  (!%p1978_p11), %s2355_s3, 256, %s1971_s28, [#allocation8], %s1851_s16, %s1851_s16, %s1852_s17  }
  0x38   : > { %s2357_s7 = sld [smem:[#allocation22_spill]] }
  0x3e   : > { %s1652_s25 = scalar_lea.hbm %s2357_s7, 256 }
  0x3f   : > { %p1653_p2 = scmp.ne.s32.totalorder %s2357_s7, %s1652_s25  ;;  %p1659_p10 = scmp.lt.u32.totalorder %s1652_s25, %s2357_s7 }
  0x41   : > { %p1655_p1 = pnand %p1653_p2, %p1994_p13 }
  0x43   : > { %p1656_p6 = pneg %p1655_p1 }
  0x45   : > { %p1661_p3 = pnand %p1659_p10, %p1656_p6 }
  0x47   : > { %1664 = shalt.err (!%p1661_p3)
}
  0x48   : > { %s1665_s28 = scalar_lea.vmem %s1982_s12, 256  ;;  %p1673_p12 = scmp.lt.s32.totalorder %s1982_s12, %s1982_s12 }
  0x49   : > { %p1666_p5 = scmp.ne.s32.totalorder %s1982_s12, %s1665_s28  ;;  %p1674_p0 = scmp.lt.s32.totalorder %s1665_s28, %s1665_s28 }
  0x4b   : > { %p1668_p7 = pnand %p1666_p5, %p1994_p13  ;;  %p1675_p2 = por %p1674_p0, %p1673_p12 }
  0x4d   : > { %p1669_p9 = pneg %p1668_p7 }
  0x4f   : > { %p1676_p1 = pnand %p1675_p2, %p1669_p9 }
  0x51   : > { %1679 = shalt.err (!%p1676_p1)
}
  0x52   : > { %1532 = dma.hbm_to_vmem [thread:$0]  (!%p1978_p11), %s2357_s7, 256, %s1982_s12, [#allocation11], %s1851_s16, %s1851_s16, %s1852_s17  }
  0x53   : > { %s2358_s8 = sld [smem:[#allocation23_spill]] }
  0x59   : > { %s1680_s18 = scalar_lea.hbm %s2358_s8, 16 }
  0x5a   : > { %p1681_p6 = scmp.ne.s32.totalorder %s2358_s8, %s1680_s18  ;;  %p1687_p5 = scmp.lt.u32.totalorder %s1680_s18, %s2358_s8 }
  0x5c   : > { %p1683_p10 = pnand %p1681_p6, %p1994_p13 }
  0x5e   : > { %p1684_p3 = pneg %p1683_p10 }
  0x60   : > { %p1689_p7 = pnand %p1687_p5, %p1684_p3 }
  0x62   : > { %1692 = shalt.err (!%p1689_p7)
}
  0x63   : > { %s1693_s28 = scalar_lea.vmem %s356_s14, 16  ;;  %s1700_s12 = scalar_lea.vmem %s356_s14, 32 }
  0x64   : > { %p1694_p9 = scmp.ne.s32.totalorder %s356_s14, %s1693_s28  ;;  %p1701_p2 = scmp.lt.s32.totalorder %s356_s14, %s356_s14 }
  0x65   : > { %p1702_p1 = scmp.lt.s32.totalorder %s1700_s12, %s1693_s28 }
  0x66   : > { %p1696_p12 = pnand %p1694_p9, %p1994_p13 }
  0x67   : > { %p1703_p4 = por %p1702_p1, %p1701_p2 }
  0x68   : > { %p1697_p0 = pneg %p1696_p12 }
  0x6a   : > { %p1704_p8 = pnand %p1703_p4, %p1697_p0 }
  0x6c   : > { %1707 = shalt.err (!%p1704_p8)
}
  0x6d   : > { %1535 = dma.hbm_to_vmem [thread:$0]  (!%p1978_p11), %s2358_s8, 16, %s356_s14, [#allocation11]  }
  0x6e   : > { %s2058_s27 = sadd.s32 1, %s1846_s22   ;;  %s60_s29 = sadd.s32 1, %s1842_s21 }
  0x6f   : > { %s57_s10 = ssub.s32 %s1846_s22, %s2058_s27  ;;  %p67_p8 = scmp.ne.s32.totalorder %s1842_s21, %s1838_s20 }
  0x70   : > { %p58_p4 = scmp.eq.s32.totalorder %s57_s10, 0  ;;  %p68_p13 = scmp.eq.s32.totalorder %s1846_s22, 0 }
  0x71   : > { %p1550_p6 = scmp.lt.s32.totalorder %s1846_s22, 2  ;;  %p2359_p3 = scmp.eq.s32.totalorder %s1948_s0, 1 }
  0x72   : > { %s2068_s11 = scalar_select %p58_p4, %s1842_s21, %s60_s29  }
  0x73   : > { %p69_p10 = por %p68_p13, %p67_p8  ;;  %p2072_p5 = por %p2359_p3, %p67_p8 }
  0x74   : > { %s372_s25 = sand.u32 1, %s1842_s21   ;;  %s1362_s18 = sshll.u32 %s1846_s22, 7 }
  0x75   : > { %s2360_s19 = scalar_select %p2072_p5, 1, 0 }
  0x76   : > { %s2078_s14 = sshll.u32 %s372_s25, 3  ;;  %s2083_s13 = scalar_lea.hbm %s2326_s1, %s1362_s18 }
  0x77   : > { %s376_s15 = scalar_lea.vmem [#allocation4], %s2078_s14  ;;  %p2086_p11 = pnand %p1550_p6, %p69_p10 }
  0x78   : > { %s383_s28 = sshll.u32 %s376_s15, 4  ;;  %s2095_s10 = scalar_lea.hbm %s2327_s2, %s1362_s18  ;;  %s2090_s28 = int_to_ptr.vmem [resolvable:$true] %s383_s28 }
  0x79   : > { %s373_s29 = scalar_lea.sflag [#allocation5], %s372_s25  ;;  %s1708_s23 = scalar_lea.hbm %s2083_s13, 128 }
  0x7a   : > { %p1709_p7 = scmp.ne.s32.totalorder %s2083_s13, %s1708_s23  ;;  %p1710_p9 = pneg %p2086_p11 }
  0x7b   : > { %s1713_s3 = scalar_lea.hbm %s2326_s1, 256  ;;  %p1714_p2 = scmp.lt.u32.totalorder %s2083_s13, %s2326_s1 }
  0x7c   : > { %p1711_p12 = pnand %p1710_p9, %p1709_p7  ;;  %p1715_p1 = scmp.lt.u32.totalorder %s1713_s3, %s1708_s23 }
  0x7d   : > { %p1717_p8 = scmp.lt.u32.totalorder %s1708_s23, %s2083_s13 }
  0x7e   : > { %p1712_p0 = pneg %p1711_p12  ;;  %p1716_p4 = por %p1715_p1, %p1714_p2 }
  0x80   : > { %p1718_p13 = por %p1717_p8, %p1716_p4 }
  0x82   : > { %p1719_p6 = pnand %p1718_p13, %p1712_p0 }
  0x84   : > { %1722 = shalt.err (!%p1719_p6)
}
  0x85   : > { %s1723_s25 = scalar_lea.vmem %s2090_s28, 128  ;;  %s1853_s18 = smov [#allocation4]  }
  0x86   : > { %p1724_p10 = scmp.ne.s32.totalorder %s2090_s28, %s1723_s25  ;;  %s1728_s16 = sshll.u32 %s1853_s18, 4  ;;  %s1729_s16 = int_to_ptr.vmem [resolvable:$false] %s1728_s16 }
  0x87   : > { %s1730_s7 = scalar_lea.vmem %s1729_s16, 256  ;;  %p1731_p12 = scmp.lt.s32.totalorder %s2090_s28, %s1729_s16 }
  0x88   : > { %p1726_p3 = pnand %p1724_p10, %p1710_p9  ;;  %p1732_p2 = scmp.lt.s32.totalorder %s1730_s7, %s1723_s25 }
  0x8a   : > { %p1727_p7 = pneg %p1726_p3  ;;  %p1733_p1 = por %p1732_p2, %p1731_p12 }
  0x8c   : > { %p1734_p4 = pnand %p1733_p1, %p1727_p7 }
  0x8e   : > { %1737 = shalt.err (!%p1734_p4)
}
  0x8f   : > { %1539 = dma.hbm_to_vmem [thread:$0]  (!%p2086_p11), %s2083_s13, 128, %s2090_s28, %s373_s29  }
  0x90   : > { %s390_s3 = sand.u32 1, %s1846_s22   ;;  %s394_s8 = scalar_lea.vmem [#allocation7], %s2078_s14 }
  0x91   : > { %s401_s17 = sshll.u32 %s394_s8, 4  ;;  %s391_s23 = scalar_lea.sflag [#allocation8], %s390_s3  ;;  %s402_s17 = int_to_ptr.vmem [resolvable:$true] %s401_s17 }
  0x92   : > { %s1738_s30 = scalar_lea.hbm %s2095_s10, 128  ;;  %s1743_s18 = scalar_lea.hbm %s2327_s2, 256 }
  0x93   : > { %p1739_p0 = scmp.ne.s32.totalorder %s2095_s10, %s1738_s30  ;;  %p1744_p6 = scmp.lt.u32.totalorder %s2095_s10, %s2327_s2 }
  0x94   : > { %p1745_p10 = scmp.lt.u32.totalorder %s1743_s18, %s1738_s30  ;;  %p1747_p7 = scmp.lt.u32.totalorder %s1738_s30, %s2095_s10 }
  0x95   : > { %p1741_p8 = pnand %p1739_p0, %p1710_p9 }
  0x96   : > { %p1746_p3 = por %p1745_p10, %p1744_p6 }
  0x97   : > { %p1742_p13 = pneg %p1741_p8 }
  0x98   : > { %p1748_p12 = por %p1747_p7, %p1746_p3 }
  0x9a   : > { %p1749_p2 = pnand %p1748_p12, %p1742_p13 }
  0x9c   : > { %1752 = shalt.err (!%p1749_p2)
}
  0x9d   : > { %s1753_s14 = scalar_lea.vmem %s402_s17, 128  ;;  %s1854_s13 = smov [#allocation7]  }
  0x9e   : > { %p1754_p1 = scmp.ne.s32.totalorder %s402_s17, %s1753_s14  ;;  %s1758_s28 = sshll.u32 %s1854_s13, 4  ;;  %s1759_s28 = int_to_ptr.vmem [resolvable:$false] %s1758_s28 }
  0x9f   : > { %s1760_s29 = scalar_lea.vmem %s1759_s28, 256  ;;  %p1761_p8 = scmp.lt.s32.totalorder %s402_s17, %s1759_s28 }
  0xa0   : > { %p1756_p4 = pnand %p1754_p1, %p1710_p9  ;;  %p1762_p5 = scmp.lt.s32.totalorder %s1760_s29, %s1753_s14 }
  0xa2   : > { %p1757_p0 = pneg %p1756_p4  ;;  %p1763_p6 = por %p1762_p5, %p1761_p8 }
  0xa4   : > { %p1764_p10 = pnand %p1763_p6, %p1757_p0 }
  0xa6   : > { %1767 = shalt.err (!%p1764_p10)
}
  0xa7   : > { %1542 = dma.hbm_to_vmem [thread:$0]  (!%p2086_p11), %s2095_s10, 128, %s402_s17, %s391_s23  }
  0xa8   : > { %p2362_p13 = scmp.ne.s32.totalorder %s2353_s26, 0 }
  0xa9   : > { %s2146_s3 = sand.u32 (!%p2362_p13), 1, %s1838_s20   ;;  %p2363_p5 = scmp.ne.s32.totalorder (!%p2362_p13), %s2350_s24, 0 }
  0xaa   : > { %410 = sbr.rel (%p2362_p13) target bundleno = 1651 (0x673), region = 64  ;;  %s2149_s8 = sshll.u32 (!%p2362_p13), %s2146_s3, 3 }
  0xab   : > { %s413_s30 = scalar_lea.sflag (!%p2362_p13), [#allocation5], %s2146_s3  ;;  %s416_s15 = scalar_lea.vmem (!%p2362_p13), [#allocation4], %s2149_s8 }
  0xb1   : > { %1813 = dma.done.wait (%p2363_p5), %s413_s30, 128  }
  0xb2   : > { %1815 = vsyncadd (%p2363_p5), %s413_s30, 4294967168  ;;  %s421_s26 = sand.u32 1, %s1948_s0   ;;  %s425_s10 = scalar_lea.vmem [#allocation7], %s2149_s8 }
  0xb3   : > { %s422_s12 = scalar_lea.sflag [#allocation8], %s421_s26 }
  0xb4   : > { %1817 = dma.done.wait (%p2363_p5), %s422_s12, 128  }
  0xb5   : > { %1819 = vsyncadd (%p2363_p5), %s422_s12, 4294967168  ;;  %p2364_p11 = scmp.eq.s32.totalorder %s1948_s0, 0 }
  0xb7   : > { %1821 = dma.done.wait (%p2364_p11), [#allocation8], 256   ;;  %p2365_p9 = pmov %p2364_p11 }
  0xb9   : > { %1823 = vsyncadd (%p2365_p9), [#allocation8], 4294967040  ;;  %p2366_p3 = pmov %p2365_p9 }
  0xbb   : > { %1825 = dma.done.wait (%p2366_p3), [#allocation11], 272   ;;  %p2367_p7 = pmov %p2366_p3 }
  0xbc   : > { %v1855_v0 = vmov 0.0   ;;  %vm1856_vm0 = vmmov 0   ;;  %v1600_v1 = vld [vmem:[%s2330_s5] sm:$0xff]   ;;  %v1601_v2 = vld [vmem:[#allocation9] sm:$0xff]   ;;  %v1603_v4 = vld [vmem:[#allocation9 + $0x8] sm:$0xff]   ;;  %vm509_vm1 = vcmask 261120  }
  0xbd   : > { %1827 = vsyncadd (%p2367_p7), [#allocation11], 4294967024  ;;  %1436 = vmatprep.subr.bf16.mxu1 %v1855_v0  ;;  %1428 = vmatprep.subr.bf16.mxu0 %v1855_v0  ;;  %v1602_v3 = vld [vmem:[%s2330_s5 + $0x8] sm:$0xff]   ;;  %v483_v5 = vld [vmem:[%s425_s10] sm:$0xff]  ;;  %vm686_vm2 = vcmask 64512   ;;  %s1857_s13 = smov 112  }
  0xbe   : > { %1440 = vmatprep.mubr.msk.bf16.mxu1 %vm1856_vm0, %v1855_v0  ;;  %1432 = vmatprep.mubr.msk.bf16.mxu0 %vm1856_vm0, %v1855_v0  ;;  %v2185_v6 = vld [vmem:[%s416_s15] sm:$0xff]  ;;  %v485_v7 = vpack.c.bf16 %v483_v5, %v483_v5  ;;  %v1376_v9 = vld [vmem:[%s2331_s6] ss:$0 sm:$0xff]  ;;  %s1858_s28 = smov 120   ;;  %s1859_s29 = smov 104   ;;  %v1604_v25 = vld [vmem:[#allocation10] sm:$0xff]  }
  0xbf   : > { %1437 = vmatpush3.bf16.msra.mxu1 %v1600_v1  ;;  %1429 = vmatpush3.bf16.msra.mxu0 %v1601_v2  ;;  %v484_v8 = vpack.c.bf16 %v2185_v6, %v2185_v6  ;;  %v1372_v10 = vld [vmem:[%s2329_s4] ss:$0 sm:$0xff]  ;;  %v1380_v41 = vld [vmem:[#allocation12] ss:$0 sm:$0xff]  ;;  %vm748_vm3 = vcmask 1043456   ;;  %s1860_s30 = smov 8  }
  0xc0   : > { %1438 = vmatprep.subr.bf16.mxu1 %v1855_v0  ;;  %1430 = vmatprep.subr.bf16.mxu0 %v1855_v0  ;;  %v1605_v26 = vld [vmem:[#allocation10 + $0x8] sm:$0xff]   ;;  %s1861_s24 = smov 16   ;;  %s1862_s17 = smov 24   ;;  %vm910_vm4 = vcmask 130112   ;;  %vm1026_vm5 = vcmask 195712   ;;  %vm1142_vm6 = vcmask 261312  }
  0xc1   : > { %s1212_s23 = sld [smem:[#allocation3]]  ;;  %s2368_s7 = sld [smem:[#allocation24_spill]] }
  0xc2   : > { %s1397_s14 = sshll.u32 %s1948_s0, 7  ;;  %s2369_s15 = sld [smem:[#allocation25_spill]] }
  0xc3   : > { %1439 = vmatpush3.bf16.msra.mxu1 %v1602_v3  ;;  %1431 = vmatpush3.bf16.msra.mxu0 %v1603_v4  ;;  %s1221_s12 = scalar_lea.sflag [#allocation6], %s2146_s3  ;;  %p2370_p2 = scmp.ne.s32.totalorder %s2360_s19, 0 }
  0xc4   : > { %1452 = vmatprep.subr.bf16.mxu1 %v1855_v0  ;;  %1444 = vmatprep.subr.bf16.mxu0 %v1855_v0  ;;  %s1863_s0 = smov [#allocation13]  }
  0xc6   : > { %1441 = vmatmul.mubr.msk.bf16.vlgmr.msra.gmra.mrb[0].mxu1 %vm509_vm1, %v485_v7  ;;  %1433 = vmatmul.mubr.msk.bf16.vlgmr.msra.gmra.mrb[0].mxu0 %vm509_vm1, %v484_v8 }
  0xc7   : > { %1454 = vmatprep.mubr.msk.bf16.mxu1 %vm1856_vm0, %v1855_v0  ;;  %1448 = vmatprep.mubr.msk.bf16.mxu0 %vm1856_vm0, %v1855_v0  ;;  %s1215_s25 = ssub.f32 1.0, %s1212_s23 }
  0xc8   : > { %1445 = vmatpush3.bf16.msra.mxu0 %v1604_v25  ;;  %s2280_s26 = scalar_lea.hbm %s2369_s15, %s1397_s14 }
  0xc9   : > { %1446 = vmatprep.subr.bf16.mxu0 %v1855_v0 }
  0xcc   : > { %1447 = vmatpush3.bf16.msra.mxu0 %v1605_v26 }
  0xcd   : > { %1458 = vmatprep.subr.bf16.mxu0 %v1855_v0 }
  0xcf   : > { %1449 = vmatmul.mubr.msk.bf16.vlgmr.msra.gmra.mrb[4].mxu0 %vm509_vm1, %v485_v7 }
  0xd0   : > { %1460 = vmatprep.mubr.msk.bf16.mxu0 %vm1856_vm0, %v1855_v0 }
 0x199   : > { %v614_v11 = vpop.f32.mrb[0].mxu1  ;;  %v547_v14 = vpop.f32.mrb[0].mxu0 }
 0x19a   : > { %v615_v12 = vadd.f32 %v1376_v9, %v614_v11  ;;  %v1442_v13 = vpop.f32.mrb[1].mxu1  ;;  %v548_v15 = vadd.f32 %v1372_v10, %v547_v14  ;;  %v1434_v17 = vpop.f32.mrb[1].mxu0 }
 0x19b   : > { %v617_v16 = vpop.f32.mrb[2].mxu1  ;;  %v550_v20 = vpop.f32.mrb[2].mxu0 }
 0x19c   : > { %v684_v18 = vpack.c.bf16 %v615_v12, %v615_v12  ;;  %v1443_v19 = vpop.f32.mrb[3].mxu1  ;;  %v553_v21 = vmul.f32 0.35355338, %v548_v15  ;;  %v1435_v22 = vpop.f32.mrb[3].mxu0 }
 0x19e   : > { %914 = vrot.lane.b32.xlu1 %v684_v18, %s1857_s13  ;;  %797 = vrot.lane.b32.xlu0 %v684_v18, %s1858_s28  ;;  %v691_v23 = vsel %vm686_vm2, %v684_v18, 0  ;;  %v683_v24 = vpack.c.bf16 %v553_v21, %v553_v21 }
 0x19f   : > { %1453 = vmatpush3.bf16.xpose.msra.mxu1 %v691_v23 }
 0x1a0   : > { %1464 = vmatprep.subr.bf16.mxu1 %v1855_v0 }
 0x1a2   : > { %912 = vrot.lane.b32.xlu1 %v683_v24, %s1857_s13  ;;  %794 = vrot.lane.b32.xlu0 %v683_v24, %s1858_s28  ;;  %v677_v42 = vpop.f32.mrb[4].mxu0 }
 0x1a3   : > { %v678_v43 = vadd.f32 %v1380_v41, %v677_v42  ;;  %v1450_v44 = vpop.f32.mrb[5].mxu0 }
 0x1a4   : > { %v680_v45 = vpop.f32.mrb[6].mxu0 }
 0x1a5   : > { %v685_v46 = vpack.c.bf16 %v678_v43, %v678_v43  ;;  %v1451_v47 = vpop.f32.mrb[7].mxu0 }
 0x1a6   : > { %1028 = vrot.lane.b32.xlu1 %v683_v24, %s1859_s29  ;;  %1030 = vrot.lane.b32.xlu0 %v684_v18, %s1859_s29 }
 0x1a7   : > { %1455 = vmatmul.mubr.msk.bf16.vlgmr.msra.gmra.mrb[4].mxu1 %vm686_vm2, %v683_v24  ;;  %v750_v48 = vsel %vm748_vm3, %v685_v46, 0 }
 0x1a8   : > { %1466 = vmatprep.mubr.msk.bf16.mxu1 %vm1856_vm0, %v1855_v0  ;;  %1459 = vmatpush3.bf16.msra.mxu0 %v750_v48 }
 0x1a9   : > { %1470 = vmatprep.subr.bf16.mxu0 %v1855_v0 }
 0x210   : > { %v798_v27 = vpop.permute.xlu0 %797  ;;  %v915_v29 = vpop.permute.xlu1 %914 }
 0x211   : > { %v803_v28 = vsel %vm686_vm2, %v798_v27, 0  ;;  %v920_v31 = vsel %vm686_vm2, %v915_v29, 0 }
 0x212   : > { %1465 = vmatpush3.bf16.xpose.msra.mxu1 %v803_v28 }
 0x213   : > { %1476 = vmatprep.subr.bf16.mxu1 %v1855_v0 }
 0x214   : > { %v795_v30 = vpop.permute.xlu0 %794  ;;  %v913_v33 = vpop.permute.xlu1 %912 }
 0x218   : > { %v1031_v32 = vpop.permute.xlu0 %1030  ;;  %v1029_v35 = vpop.permute.xlu1 %1028 }
 0x219   : > { %1467 = vmatmul.mubr.msk.bf16.vlgmr.msra.gmra.mrb[8].mxu1 %vm686_vm2, %v795_v30  ;;  %v1036_v34 = vsel %vm686_vm2, %v1031_v32, 0 }
 0x21a   : > { %1477 = vmatpush3.bf16.xpose.msra.mxu1 %v920_v31  ;;  %1478 = vmatprep.mubr.msk.bf16.mxu1 %vm1856_vm0, %v1855_v0 }
 0x21b   : > { %1488 = vmatprep.subr.bf16.mxu1 %v1855_v0 }
 0x221   : > { %1479 = vmatmul.mubr.msk.bf16.vlgmr.msra.gmra.mrb[12].mxu1 %vm686_vm2, %v913_v33 }
 0x222   : > { %1489 = vmatpush3.bf16.xpose.msra.mxu1 %v1036_v34  ;;  %1490 = vmatprep.mubr.msk.bf16.mxu1 %vm1856_vm0, %v1855_v0 }
 0x223   : > { %1500 = vmatprep.subr.bf16.mxu1 %v1855_v0 }
 0x229   : > { %1491 = vmatmul.mubr.msk.bf16.vlgmr.msra.gmra.mrb[16].mxu1 %vm686_vm2, %v1029_v35 }
 0x22a   : > { %1504 = vmatprep.mubr.msk.bf16.mxu1 %vm1856_vm0, %v1855_v0 }
 0x27a   : > { %v727_v36 = vpop.f32.mrb[4].mxu1 }
 0x27b   : > { %v1456_v37 = vpop.f32.mrb[5].mxu1  ;;  %v733_v38 = vsel %vm686_vm2, %v727_v36, -inf }
 0x27c   : > { %734 = vmax.xlane.f32.xlu0 %v733_v38  ;;  %v730_v39 = vpop.f32.mrb[6].mxu1 }
 0x27d   : > { %v1457_v40 = vpop.f32.mrb[7].mxu1 }
 0x2ec   : > { %v839_v49 = vpop.f32.mrb[8].mxu1 }
 0x2ed   : > { %v1468_v50 = vpop.f32.mrb[9].mxu1  ;;  %v845_v51 = vsel %vm686_vm2, %v839_v49, -inf }
 0x2ee   : > { %846 = vmax.xlane.f32.xlu1 %v845_v51  ;;  %v842_v52 = vpop.f32.mrb[10].mxu1 }
 0x2ef   : > { %v1469_v53 = vpop.f32.mrb[11].mxu1  ;;  %v1606_v52 = vld [vmem:[%s2334_s9] sm:$0xff]  }
 0x2f0   : > { %1501 = vmatpush3.bf16.msra.mxu1 %v1606_v52  ;;  %v1607_v53 = vld [vmem:[%s2334_s9 + $0x8] sm:$0xff]  }
 0x2f1   : > { %1502 = vmatprep.subr.bf16.mxu1 %v1855_v0 }
 0x2f4   : > { %v956_v54 = vpop.f32.mrb[12].mxu1  ;;  %1503 = vmatpush3.bf16.msra.mxu1 %v1607_v53 }
 0x2f5   : > { %v1480_v55 = vpop.f32.mrb[13].mxu1  ;;  %v962_v56 = vsel %vm686_vm2, %v956_v54, -inf }
 0x2f6   : > { %963 = vmax.xlane.f32.xlu0 %v962_v56  ;;  %v959_v57 = vpop.f32.mrb[14].mxu1 }
 0x2f7   : > { %v1481_v58 = vpop.f32.mrb[15].mxu1 }
 0x2fc   : > { %v1072_v59 = vpop.f32.mrb[16].mxu1 }
 0x2fd   : > { %v1492_v60 = vpop.f32.mrb[17].mxu1  ;;  %v1078_v61 = vsel %vm686_vm2, %v1072_v59, -inf }
 0x2fe   : > { %1079 = vmax.xlane.f32.xlu0 %v1078_v61  ;;  %v1075_v62 = vpop.f32.mrb[18].mxu1 }
 0x2ff   : > { %v1493_v63 = vpop.f32.mrb[19].mxu1 }
 0x309   : > { %v735_v1 = vpop.xlane.xlu0 %734 }
 0x30a   : > { %v736_v2 = vsub.f32 %v727_v36, %v735_v1 }
 0x30c   : > { %v737_v3 = vmul.f32 1.442695, %v736_v2 }
 0x30e   : > { %1608 = vpow2.f32 %v737_v3  ;;  %v1392_v3 = vld [vmem:[%s2368_s7] ss:$0 sm:$0xff] }
 0x318   : > { %v1609_v4 = vpop.eup %1608 }
 0x319   : > { %v739_v5 = vsel %vm686_vm2, %v1609_v4, 0.0 }
 0x31a   : > { %740 = vadd.xlane.f32.xlu1 %v739_v5 }
 0x32b   : > { %858 = vrot.lane.b32.xlu1 %v685_v46, %s1858_s28 }
 0x37b   : > { %v847_v7 = vpop.xlane.xlu1 %846 }
 0x37c   : > { %v848_v8 = vsub.f32 %v839_v49, %v847_v7  ;;  %v1216_v7 = vstv %s1215_s25 }
 0x37e   : > { %v849_v9 = vmul.f32 1.442695, %v848_v8 }
 0x380   : > { %1610 = vpow2.f32 %v849_v9 }
 0x383   : > { %v964_v10 = vpop.xlane.xlu0 %963 }
 0x384   : > { %v965_v11 = vsub.f32 %v956_v54, %v964_v10 }
 0x386   : > { %v966_v12 = vmul.f32 1.442695, %v965_v11 }
 0x388   : > { %1612 = vpow2.f32 %v966_v12 }
 0x38a   : > { %v1611_v13 = vpop.eup %1610 }
 0x38b   : > { %v1080_v14 = vpop.xlane.xlu0 %1079  ;;  %v851_v15 = vsel %vm686_vm2, %v1611_v13, 0.0 }
 0x38c   : > { %v1081_v16 = vsub.f32 %v1072_v59, %v1080_v14  ;;  %852 = vadd.xlane.f32.xlu0 %v851_v15 }
 0x38e   : > { %v1082_v17 = vmul.f32 1.442695, %v1081_v16 }
 0x390   : > { %1614 = vpow2.f32 %v1082_v17 }
 0x392   : > { %v1613_v18 = vpop.eup %1612 }
 0x393   : > { %v968_v19 = vsel %vm686_vm2, %v1613_v18, 0.0 }
 0x394   : > { %969 = vadd.xlane.f32.xlu1 %v968_v19 }
 0x39a   : > { %v1615_v20 = vpop.eup %1614 }
 0x39b   : > { %v1084_v21 = vsel %vm686_vm2, %v1615_v20, 0.0 }
 0x39c   : > { %1085 = vadd.xlane.f32.xlu0 %v1084_v21 }
 0x3a5   : > { %1090 = vrot.lane.b32.xlu1 %v685_v46, %s1859_s29 }
 0x3a7   : > { %v741_v22 = vpop.xlane.xlu1 %740 }
 0x3a8   : > { %1616 = vrcp.f32 %v741_v22 }
 0x3ab   : > { %v859_v24 = vpop.permute.xlu1 %858 }
 0x3ac   : > { %v864_v27 = vsel %vm748_vm3, %v859_v24, 0 }
 0x3b2   : > { %v1617_v23 = vpop.eup %1616  ;;  %974 = vrot.lane.b32.xlu0 %v685_v46, %s1857_s13  ;;  %s480_s13 = scalar_lea.vmem [#allocation13], %s2149_s8  ;;  %s1772_s8 = sshll.u32 %s1863_s0, 4  ;;  %s1773_s8 = int_to_ptr.vmem [resolvable:$false] %s1772_s8 }
 0x3b3   : > { %v743_v25 = vmul.f32 %v1617_v23, %v1609_v4  ;;  %v1213_v4 = vstv %s1212_s23  ;;  %s1234_s28 = sshll.u32 %s480_s13, 4  ;;  %s2282_s28 = int_to_ptr.vmem [resolvable:$true] %s1234_s28 }
 0x3b4   : > { %v1214_v9 = vmul.f32 %v1213_v4, %v2185_v6  ;;  %s1768_s10 = scalar_lea.vmem %s2282_s28, 128  ;;  %p1775_p0 = scmp.lt.s32.totalorder %s2282_s28, %s1773_s8 }
 0x3b5   : > { %v744_v26 = vpack.c.bf16 %v743_v25, %v743_v25  ;;  %p1769_p12 = scmp.ne.s32.totalorder %s2282_s28, %s1768_s10 }
 0x3b7   : > { %1461 = vmatmul.mubr.msk.bf16.vlgmr.msra.gmra.mrb[8].mxu0 %vm686_vm2, %v744_v26  ;;  %p1770_p1 = pnand %p1769_p12, %p2370_p2 }
 0x3b8   : > { %1471 = vmatpush3.bf16.msra.mxu0 %v864_v27  ;;  %1472 = vmatprep.mubr.msk.bf16.mxu0 %vm1856_vm0, %v1855_v0 }
 0x3b9   : > { %1482 = vmatprep.subr.bf16.mxu0 %v1855_v0  ;;  %p1771_p4 = pneg %p1770_p1 }
 0x419   : > { %v853_v28 = vpop.xlane.xlu0 %852 }
 0x41a   : > { %1618 = vrcp.f32 %v853_v28 }
 0x421   : > { %v970_v29 = vpop.xlane.xlu1 %969 }
 0x422   : > { %1620 = vrcp.f32 %v970_v29 }
 0x424   : > { %v1619_v30 = vpop.eup %1618 }
 0x425   : > { %v855_v31 = vmul.f32 %v1619_v30, %v1611_v13  ;;  %v1091_v38 = vpop.permute.xlu1 %1090 }
 0x426   : > { %v1096_v40 = vsel %vm748_vm3, %v1091_v38, 0 }
 0x427   : > { %v856_v32 = vpack.c.bf16 %v855_v31, %v855_v31 }
 0x429   : > { %v1086_v33 = vpop.xlane.xlu0 %1085  ;;  %1473 = vmatmul.mubr.msk.bf16.vlgmr.msra.gmra.mrb[12].mxu0 %vm686_vm2, %v856_v32 }
 0x42a   : > { %1622 = vrcp.f32 %v1086_v33  ;;  %1484 = vmatprep.mubr.msk.bf16.mxu0 %vm1856_vm0, %v1855_v0 }
 0x42c   : > { %v1621_v34 = vpop.eup %1620 }
 0x42d   : > { %v972_v35 = vmul.f32 %v1621_v34, %v1613_v18  ;;  %v975_v36 = vpop.permute.xlu0 %974 }
 0x42e   : > { %v980_v37 = vsel %vm748_vm3, %v975_v36, 0 }
 0x42f   : > { %1483 = vmatpush3.bf16.msra.mxu0 %v980_v37  ;;  %v973_v39 = vpack.c.bf16 %v972_v35, %v972_v35 }
 0x430   : > { %1494 = vmatprep.subr.bf16.mxu0 %v1855_v0 }
 0x432   : > { %1485 = vmatmul.mubr.msk.bf16.vlgmr.msra.gmra.mrb[16].mxu0 %vm686_vm2, %v973_v39 }
 0x433   : > { %1495 = vmatpush3.bf16.msra.mxu0 %v1096_v40  ;;  %1496 = vmatprep.mubr.msk.bf16.mxu0 %vm1856_vm0, %v1855_v0 }
 0x434   : > { %v1623_v41 = vpop.eup %1622 }
 0x435   : > { %v1088_v42 = vmul.f32 %v1623_v41, %v1615_v20 }
 0x437   : > { %v1089_v43 = vpack.c.bf16 %v1088_v42, %v1088_v42 }
 0x43a   : > { %1497 = vmatmul.mubr.msk.bf16.vlgmr.msra.gmra.mrb[20].mxu0 %vm686_vm2, %v1089_v43 }
 0x48a   : > { %v786_v44 = vpop.f32.mrb[8].mxu0 }
 0x48b   : > { %792 = vst.msk [vmem:[#allocation2] sm:$0xff] %vm686_vm2, %v786_v44  ;;  %v1462_v45 = vpop.f32.mrb[9].mxu0 }
 0x48c   : > { %v789_v46 = vpop.f32.mrb[10].mxu0 }
 0x48d   : > { %v1463_v47 = vpop.f32.mrb[11].mxu0 }
 0x4fc   : > { %v900_v48 = vpop.f32.mrb[12].mxu0 }
 0x4fd   : > { %907 = vrot.lane.b32.xlu1 %v900_v48, %s1860_s30  ;;  %v1474_v49 = vpop.f32.mrb[13].mxu0 }
 0x4fe   : > { %v903_v50 = vpop.f32.mrb[14].mxu0 }
 0x4ff   : > { %v1475_v51 = vpop.f32.mrb[15].mxu0 }
 0x505   : > { %v1016_v54 = vpop.f32.mrb[16].mxu0 }
 0x506   : > { %1023 = vrot.lane.b32.xlu0 %v1016_v54, %s1861_s24  ;;  %v1486_v55 = vpop.f32.mrb[17].mxu0  ;;  %s1774_s24 = scalar_lea.vmem %s1773_s8, 256 }
 0x507   : > { %v1019_v56 = vpop.f32.mrb[18].mxu0  ;;  %p1776_p8 = scmp.lt.s32.totalorder %s1774_s24, %s1768_s10 }
 0x508   : > { %v1487_v57 = vpop.f32.mrb[19].mxu0 }
 0x509   : > { %p1777_p6 = por %p1776_p8, %p1775_p0 }
 0x50b   : > { %p1778_p10 = pnand %p1777_p6, %p1771_p4 }
 0x50d   : > { %v1132_v58 = vpop.f32.mrb[20].mxu0 }
 0x50e   : > { %1139 = vrot.lane.b32.xlu1 %v1132_v58, %s1862_s17  ;;  %v1498_v59 = vpop.f32.mrb[21].mxu0 }
 0x50f   : > { %v1135_v60 = vpop.f32.mrb[22].mxu0 }
 0x510   : > { %v1499_v61 = vpop.f32.mrb[23].mxu0 }
 0x56f   : > { %v908_v62 = vpop.permute.xlu1 %907 }
 0x570   : > { %911 = vst.msk [vmem:[#allocation2] sm:$0xff] %vm910_vm4, %v908_v62 }
 0x578   : > { %v1024_v63 = vpop.permute.xlu0 %1023 }
 0x579   : > { %1027 = vst.msk [vmem:[#allocation2] sm:$0xff] %vm1026_vm5, %v1024_v63 }
 0x580   : > { %v1140_v0 = vpop.permute.xlu1 %1139 }
 0x581   : > { %1143 = vst.msk [vmem:[#allocation2] sm:$0xff] %vm1142_vm6, %v1140_v0 }
 0x588   : > { %v1144_v1 = vld [vmem:[#allocation2] sm:$0xff] }
 0x589   : > { %v1145_v2 = vpack.c.bf16 %v1144_v1, %v1144_v1 }
 0x58b   : > { %1505 = vmatmul.mubr.msk.bf16.vlgmr.msra.gmra.mrb[20].mxu1 %vm509_vm1, %v1145_v2 }
 0x65e   : > { %v1206_v5 = vpop.f32.mrb[20].mxu1 }
 0x65f   : > { %v1207_v8 = vadd.f32 %v1392_v3, %v1206_v5  ;;  %v1506_v10 = vpop.f32.mrb[21].mxu1 }
 0x660   : > { %v1209_v11 = vpop.f32.mrb[22].mxu1 }
 0x661   : > { %v1217_v12 = vmul.f32 %v1216_v7, %v1207_v8  ;;  %v1507_v13 = vpop.f32.mrb[23].mxu1 }
 0x663   : > { %v1218_v14 = vadd.f32 %v1217_v12, %v1214_v9 }
 0x665   : > { %1219 = vst.msk [vmem:[%s480_s13] sm:$0xff] %vm509_vm1, %v1218_v14 }
 0x666   : > { %1781 = shalt.err (!%p1778_p10)
}
 0x667   : > { %s1782_s3 = scalar_lea.hbm %s2280_s26, 128  ;;  %s1786_s25 = scalar_lea.hbm %s2369_s15, 256 }
 0x668   : > { %p1783_p13 = scmp.ne.s32.totalorder %s2280_s26, %s1782_s3  ;;  %p1787_p9 = scmp.lt.u32.totalorder %s2280_s26, %s2369_s15 }
 0x669   : > { %p1788_p3 = scmp.lt.u32.totalorder %s1786_s25, %s1782_s3  ;;  %p1790_p12 = scmp.lt.u32.totalorder %s1782_s3, %s2280_s26 }
 0x66a   : > { %p1784_p5 = pnand %p1783_p13, %p2370_p2 }
 0x66b   : > { %p1789_p7 = por %p1788_p3, %p1787_p9 }
 0x66c   : > { %p1785_p11 = pneg %p1784_p5 }
 0x66d   : > { %p1791_p1 = por %p1790_p12, %p1789_p7 }
 0x66f   : > { %p1792_p4 = pnand %p1791_p1, %p1785_p11 }
 0x671   : > { %1795 = shalt.err (!%p1792_p4)
}
 0x672   : > { %1524 = dma.vmem_to_hbm [thread:$0]  (%p2370_p2), %s2282_s28, 128, %s2280_s26, %s1221_s12  }
 0x673 PF: > { %s2371_s7 = sld [smem:[#allocation19_spill]]  ;;  %s2372_s14 = sld [smem:[#allocation20_spill]] }
 0x674   : > { %p2374_p8 = scmp.ge.s32.totalorder %s1846_s22, 2 }
 0x679   : > { %s1246_s13 = sand.u32 1, %s2371_s7   ;;  %p2373_p0 = scmp.ne.s32.totalorder %s2372_s14, 0 }
 0x67a   : > { %s1247_s29 = scalar_lea.sflag [#allocation6], %s1246_s13 }
 0x67b   : > { %p1544_p6 = pnand %p2374_p8, %p2373_p0 }
 0x67d   : > { %1829 = dma.done.wait (!%p1544_p6), %s1247_s29, 128  }
 0x67e   : > { %1831 = vsyncadd (!%p1544_p6), %s1247_s29, 4294967168  ;;  %p29_p10 = scmp.ge.s32.totalorder %s2058_s27, 4   ;;  %s2375_s19 = smov %s1838_s20 }
 0x67f   : > { %s2376_s20 = smov %s1842_s21  ;;  %s2377_s21 = smov %s2068_s11 }
 0x680   : > { %s2378_s22 = smov %s2058_s27  ;;  %31 = sbr.rel (!%p29_p10) target bundleno = 15 (0xf), region = 134 }
 0x687   :  { %1252 = vsyncpa [#allocation5], 1 }
 0x688   :  { %1254 = vsyncpa [#allocation5 + $0x1], 1 }
 0x689   :  { %1255 = vsyncpa [#allocation8], 1 }
 0x68a   :  { %1257 = vsyncpa [#allocation8 + $0x1], 1 }
 0x68b   :  { %1258 = vsyncpa [#allocation11], 1 }
 0x68c   :  { %1259 = vsyncpa [#allocation6], 1 }
 0x68d   :  { %1261 = vsyncpa [#allocation6 + $0x1], 1 }

</bundles_post_ra>
